<compile_context>
chip_gen: v7x
topology: tpu7x:2x2x1
jax: 0.10.0
libtpu: 0.0.40
codegen_flags: <defaults>
</compile_context>

<pallas_src>
import jax
import jax.numpy as jnp
from jax.experimental import pallas as pl
from jax.experimental.pallas import tpu as pltpu

# Real (PyTorch) sizes.
IN_SIZE = 2
HID_SIZE = 3
OUT_SIZE = 1

# Padded tile sizes. Last two dims of every block are either (8,128)-aligned or
# equal the full (small) array dims, which satisfies the TPU layout rule.
PAD_B = 8      # batch rows per tile
PAD_IN = 8     # input features   (real: 2)  -- shrunk from 128
PAD_H = 128    # hidden features  (real: 3)
PAD_OUT = 128  # output features  (real: 1)  -- kept lane-dense


def _mlp_kernel(x_ref, w1_ref, w2_ref, o_ref):
    # z  = X @ W1 ; z2 = sigmoid(z)
    z = jnp.dot(x_ref[...], w1_ref[...], preferred_element_type=jnp.float32)
    z2 = jax.nn.sigmoid(z)
    # z3 = z2 @ W2 ; o = sigmoid(z3)
    z3 = jnp.dot(z2, w2_ref[...], preferred_element_type=jnp.float32)
    o_ref[...] = jax.nn.sigmoid(z3).astype(o_ref.dtype)


def pad_weights(w1, w2):
    """Pad the (2,3) and (3,1) weights once, at init time (not per call)."""
    w1_p = jnp.zeros((PAD_IN, PAD_H), jnp.float32).at[:IN_SIZE, :HID_SIZE].set(w1)
    w2_p = jnp.zeros((PAD_H, PAD_OUT), jnp.float32).at[:HID_SIZE, :OUT_SIZE].set(w2)
    return w1_p, w2_p


@jax.jit
def neural_network_forward_padded(x, w1_p, w2_p):
    """Forward pass given pre-padded weights.

    x:    (B, 2)        float32
    w1_p: (8, 128)      float32 (zero-padded W1)
    w2_p: (128, 128)    float32 (zero-padded W2)
    returns: (B, 1)     float32
    """
    b = x.shape[0]

    if b <= PAD_B:
        # --- single-tile path: no grid, no pipeline machinery -----------------
        x_p = jnp.zeros((PAD_B, PAD_IN), jnp.float32).at[:b, :IN_SIZE].set(x)
        out_p = pl.pallas_call(
            _mlp_kernel,
            out_shape=jax.ShapeDtypeStruct((PAD_B, PAD_OUT), jnp.float32),
            in_specs=[
                pl.BlockSpec(memory_space=pltpu.MemorySpace.VMEM),
                pl.BlockSpec(memory_space=pltpu.MemorySpace.VMEM),
                pl.BlockSpec(memory_space=pltpu.MemorySpace.VMEM),
            ],
            out_specs=pl.BlockSpec(memory_space=pltpu.MemorySpace.VMEM),
        )(x_p, w1_p, w2_p)
        return out_p[:b, :OUT_SIZE]

    # --- batched path: grid over row tiles, weights resident ------------------
    nb = pl.cdiv(b, PAD_B)
    pb = nb * PAD_B
    x_p = jnp.zeros((pb, PAD_IN), jnp.float32).at[:b, :IN_SIZE].set(x)
    out_p = pl.pallas_call(
        _mlp_kernel,
        out_shape=jax.ShapeDtypeStruct((pb, PAD_OUT), jnp.float32),
        grid=(nb,),
        in_specs=[
            pl.BlockSpec((PAD_B, PAD_IN), lambda i: (i, 0)),
            pl.BlockSpec((PAD_IN, PAD_H), lambda i: (0, 0)),
            pl.BlockSpec((PAD_H, PAD_OUT), lambda i: (0, 0)),
        ],
        out_specs=pl.BlockSpec((PAD_B, PAD_OUT), lambda i: (i, 0)),
        compiler_params=pltpu.CompilerParams(
            dimension_semantics=("parallel",)),
    )(x_p, w1_p, w2_p)
    return out_p[:b, :OUT_SIZE]


def neural_network_forward(x, w1, w2):
    """Convenience wrapper taking unpadded (2,3)/(3,1) weights."""
    w1_p, w2_p = pad_weights(w1, w2)
    return neural_network_forward_padded(x, w1_p, w2_p)


def _reference_forward(x, w1, w2):
    z2 = jax.nn.sigmoid(x @ w1)
    return jax.nn.sigmoid(z2 @ w2)


# TODO(synk): backward()/train()/saveWeights() and the print() side effects of
# the PyTorch sigmoid are out of scope for the forward-pass kernel.

if __name__ == "__main__":
    key = jax.random.PRNGKey(0)
    kx, k1, k2 = jax.random.split(key, 3)

    # Deterministic "torch.randn"-style parameter init.
    W1 = jax.random.normal(k1, (IN_SIZE, HID_SIZE), jnp.float32)
    W2 = jax.random.normal(k2, (HID_SIZE, OUT_SIZE), jnp.float32)

    # Small batch of (hours sleeping, hours studying)-style inputs.
    X = jax.random.uniform(kx, (4, IN_SIZE), jnp.float32, minval=0.0, maxval=10.0)

    # Weights padded once (hoisted out of the per-call path).
    W1_p, W2_p = pad_weights(W1, W2)

    out = neural_network_forward_padded(X, W1_p, W2_p)
    jax.block_until_ready(out)

    ref = _reference_forward(X, W1, W2)
    assert out.shape == (4, OUT_SIZE)
    assert jnp.allclose(out, ref, atol=1e-5, rtol=1e-5), (out, ref)

    # Also exercise the gridded (batched, "parallel") path for correctness.
    Xb = jax.random.uniform(jax.random.PRNGKey(1), (20, IN_SIZE), jnp.float32,
                            minval=0.0, maxval=10.0)
    out_b = neural_network_forward_padded(Xb, W1_p, W2_p)
    jax.block_until_ready(out_b)
    ref_b = _reference_forward(Xb, W1, W2)
    assert out_b.shape == (20, OUT_SIZE)
    assert jnp.allclose(out_b, ref_b, atol=1e-5, rtol=1e-5), (out_b, ref_b)

    print("KERNEL_OK")
</pallas_src>

<mosaic_0001>
module attributes {stable_mosaic.version = 11 : i64} {
  func.func @_mlp_kernel(%arg0: memref<8x8xf32, #tpu.memory_space<vmem>>, %arg1: memref<8x128xf32, #tpu.memory_space<vmem>>, %arg2: memref<128x128xf32, #tpu.memory_space<vmem>>, %arg3: memref<8x128xf32, #tpu.memory_space<vmem>>) attributes {dimension_semantics = [], scalar_prefetch = 0 : i64, scratch_operands = 0 : i64, tpu.core_type = #tpu.core_type<tc>} {
    %c0 = arith.constant 0 : index
    %c0_0 = arith.constant 0 : index
    %0 = vector.load %arg0[%c0, %c0_0] : memref<8x8xf32, #tpu.memory_space<vmem>>, vector<8x8xf32>
    %c0_1 = arith.constant 0 : index
    %c0_2 = arith.constant 0 : index
    %1 = vector.load %arg1[%c0_1, %c0_2] : memref<8x128xf32, #tpu.memory_space<vmem>>, vector<8x128xf32>
    %cst = arith.constant dense<0.000000e+00> : vector<8x128xf32>
    %2 = tpu.matmul %0, %1, %cst {dimension_numbers = #tpu.dot_dimension_numbers<[1], [0], [0], [1], [0, 0, 1, 1], [], []>} : vector<8x8xf32>, vector<8x128xf32>, vector<8x128xf32> -> vector<8x128xf32>
    %3 = arith.negf %2 : vector<8x128xf32>
    %4 = math.exp %3 : vector<8x128xf32>
    %cst_3 = arith.constant 1.000000e+00 : f32
    %5 = vector.broadcast %cst_3 : f32 to vector<8x128xf32>
    %6 = arith.addf %5, %4 : vector<8x128xf32>
    %7 = arith.divf %5, %6 : vector<8x128xf32>
    %c0_4 = arith.constant 0 : index
    %c0_5 = arith.constant 0 : index
    %8 = vector.load %arg2[%c0_4, %c0_5] : memref<128x128xf32, #tpu.memory_space<vmem>>, vector<128x128xf32>
    %cst_6 = arith.constant dense<0.000000e+00> : vector<8x128xf32>
    %9 = tpu.matmul %7, %8, %cst_6 {dimension_numbers = #tpu.dot_dimension_numbers<[1], [0], [0], [1], [0, 0, 1, 1], [], []>} : vector<8x128xf32>, vector<128x128xf32>, vector<8x128xf32> -> vector<8x128xf32>
    %10 = arith.negf %9 : vector<8x128xf32>
    %11 = math.exp %10 : vector<8x128xf32>
    %cst_7 = arith.constant 1.000000e+00 : f32
    %12 = vector.broadcast %cst_7 : f32 to vector<8x128xf32>
    %13 = arith.addf %12, %11 : vector<8x128xf32>
    %14 = arith.divf %12, %13 : vector<8x128xf32>
    %c0_8 = arith.constant 0 : index
    %c0_9 = arith.constant 0 : index
    %15 = vector.load %arg3[%c0_8, %c0_9] : memref<8x128xf32, #tpu.memory_space<vmem>>, vector<8x128xf32>
    tpu.vector_store %arg3[%c0_8, %c0_9], %14 {strides = array<i32>} : memref<8x128xf32, #tpu.memory_space<vmem>>, vector<8x128xf32>,
    return
  }
}

</mosaic_0001>

<bundles_post_ra>
// kernel: neural_network_forward_padded.1
= control target key start
LH: loop header
LB: loop body
LE: loop exit
PB: predicated region body
PF: predicated region fallthrough
CT: control target
= control target key end

     0   :  { %8 = vsyncpa [#allocation3], 0  ;;  %s332_s12 = smov [#allocation2]   ;;  %s379_s0 = inlined_call_operand.vmem [shape: f32[8,8], index: 0, kind: input, shape index: {}]   ;;  %s380_s1 = inlined_call_operand.vmem [shape: f32[8,128], index: 1, kind: input, shape index: {}]   ;;  %s381_s2 = inlined_call_operand.hbm [shape: f32[128,128], index: 2, kind: input, shape index: {}]   ;;  %s382_s3 = inlined_call_operand.vmem [shape: f32[8,128], index: 3, kind: output, shape index: {}]  }
   0x1   :  { %s18_s13 = sshll.u32 %s332_s12, 4  ;;  %s308_s16 = scalar_lea.hbm %s381_s2, 2048  ;;  %s19_s13 = int_to_ptr.vmem [resolvable:$true] %s18_s13 }
   0x2   :  { %p309_p0 = scmp.ne.s32.totalorder %s381_s2, %s308_s16  ;;  %p312_p1 = scmp.lt.u32.totalorder %s308_s16, %s381_s2 }
   0x4   :  { %p314_p2 = pnand %p312_p1, %p309_p0 }
   0x6   :  { %317 = shalt.err (!%p314_p2)
}
   0x7   :  { %s318_s21 = scalar_lea.vmem %s19_s13, 2048  ;;  %p323_p4 = scmp.lt.s32.totalorder %s19_s13, %s19_s13 }
   0x8   :  { %p319_p3 = scmp.ne.s32.totalorder %s19_s13, %s318_s21  ;;  %p324_p5 = scmp.lt.s32.totalorder %s318_s21, %s318_s21 }
   0xa   :  { %p325_p6 = por %p324_p5, %p323_p4 }
   0xc   :  { %p326_p7 = pnand %p325_p6, %p319_p3 }
   0xe   :  { %329 = shalt.err (!%p326_p7)
}
   0xf   :  { %s333_s22 = smov 128   ;;  %s334_s23 = smov 8  }
  0x10   :  { %24 = dma.hbm_to_vmem [thread:$0]  %s381_s2, 2048, %s19_s13, [#allocation3], %s333_s22, %s333_s22, %s334_s23  }
  0x11   :  { %330 = dma.done.wait [#allocation3], 2048  }
  0x12   :  { %331 = vsyncadd [#allocation3], 4294965248  ;;  %v335_v0 = vmov 0.0   ;;  %vm336_vm0 = vmmov 0   ;;  %v337_v1 = vmov 0.0|0.0   ;;  %vm30_vm1 = vcmask 64512  }
  0x13   :  { %230 = vmatprep.subr.mxu0 %v335_v0  ;;  %232 = vmatprep.mubr.msk.f32.mxu0 %vm336_vm0, %v335_v0  ;;  %v29_v2 = vld [vmem:[%s380_s1] sm:$0xff]  ;;  %v111_v5 = vld [vmem:[#allocation2 + $0x8] sm:$0xff]  ;;  %v112_v7 = vld [vmem:[#allocation2 + $0x10] sm:$0xff] }
  0x14   :  { %270 = vmatprep.subr.bf16.mxu1 %v337_v1  ;;  %267 = vmatprep.mubr.msk.f32.mxu1 %vm336_vm0, %v335_v0  ;;  %v28_v3 = vld [vmem:[%s379_s0] sm:$0xff]  ;;  %v113_v8 = vld [vmem:[#allocation2 + $0x18] sm:$0xff]  ;;  %v115_v11 = vld [vmem:[#allocation2 + $0x28] sm:$0xff] }
  0x15   :  { %v110_v4 = vld [vmem:[#allocation2] sm:$0xff]  ;;  %231 = vmatpush3.msra.mxu0 %v29_v2  ;;  %v274_v9 = vpack.c.bf16 %v113_v8, %v112_v7  ;;  %v116_v13 = vld [vmem:[#allocation2 + $0x30] sm:$0xff]  ;;  %v117_v14 = vld [vmem:[#allocation2 + $0x38] sm:$0xff] }
  0x16   :  { %233 = vmatmul.mubr.msk.f32.vlgmr.msra.gmra.mrb[0].mxu0 %vm30_vm1, %v28_v3  ;;  %v271_v6 = vpack.c.bf16 %v111_v5, %v110_v4  ;;  %v114_v10 = vld [vmem:[#allocation2 + $0x20] sm:$0xff]  ;;  %v280_v15 = vpack.c.bf16 %v117_v14, %v116_v13  ;;  %v119_v17 = vld [vmem:[#allocation2 + $0x48] sm:$0xff]  ;;  %v120_v19 = vld [vmem:[#allocation2 + $0x50] sm:$0xff] }
  0x17   :  { %v277_v12 = vpack.c.bf16 %v115_v11, %v114_v10  ;;  %v118_v16 = vld [vmem:[#allocation2 + $0x40] sm:$0xff]  ;;  %v121_v20 = vld [vmem:[#allocation2 + $0x58] sm:$0xff]  ;;  %v123_v23 = vld [vmem:[#allocation2 + $0x68] sm:$0xff] }
  0x18   :  { %272 = vmatpush3.bf16.msra.mxu1 %v271_v6  ;;  %v283_v18 = vpack.c.bf16 %v119_v17, %v118_v16  ;;  %v286_v21 = vpack.c.bf16 %v121_v20, %v120_v19  ;;  %v122_v22 = vld [vmem:[#allocation2 + $0x60] sm:$0xff]  ;;  %v124_v25 = vld [vmem:[#allocation2 + $0x70] sm:$0xff]  ;;  %v125_v26 = vld [vmem:[#allocation2 + $0x78] sm:$0xff] }
  0x19   :  { %273 = vmatprep.subr.bf16.mxu1 %v337_v1  ;;  %v289_v24 = vpack.c.bf16 %v123_v23, %v122_v22  ;;  %v292_v27 = vpack.c.bf16 %v125_v26, %v124_v25 }
  0x1c   :  { %275 = vmatpush3.bf16.msra.mxu1 %v274_v9 }
  0x1d   :  { %276 = vmatprep.subr.bf16.mxu1 %v337_v1 }
  0x20   :  { %278 = vmatpush3.bf16.msra.mxu1 %v277_v12 }
  0x21   :  { %279 = vmatprep.subr.bf16.mxu1 %v337_v1 }
  0x24   :  { %281 = vmatpush3.bf16.msra.mxu1 %v280_v15 }
  0x25   :  { %282 = vmatprep.subr.bf16.mxu1 %v337_v1 }
  0x28   :  { %284 = vmatpush3.bf16.msra.mxu1 %v283_v18 }
  0x29   :  { %285 = vmatprep.subr.bf16.mxu1 %v337_v1 }
  0x2c   :  { %287 = vmatpush3.bf16.msra.mxu1 %v286_v21 }
  0x2d   :  { %288 = vmatprep.subr.bf16.mxu1 %v337_v1 }
  0x30   :  { %290 = vmatpush3.bf16.msra.mxu1 %v289_v24 }
  0x31   :  { %291 = vmatprep.subr.bf16.mxu1 %v337_v1 }
  0x34   :  { %293 = vmatpush3.bf16.msra.mxu1 %v292_v27 }
  0xe9   :  { %v100_v28 = vpop.f32.mrb[0].mxu0 }
  0xea   :  { %v209_v29 = vmul.f32 -1.442695, %v100_v28  ;;  %v234_v30 = vpop.f32.mrb[1].mxu0 }
  0xec   :  { %300 = vpow2.f32 %v209_v29 }
  0xf6   :  { %v301_v31 = vpop.eup %300 }
  0xf7   :  { %v107_v32 = vadd.f32 1.0, %v301_v31 }
  0xf9   :  { %302 = vrcp.f32 %v107_v32 }
 0x103   :  { %v303_v33 = vpop.eup %302 }
 0x104   :  { %268 = vmatmul.mubr.f32.vlgmr.msra.gmra.mrb[0].mxu1 %v303_v33 }
 0x1d7   :  { %v192_v34 = vpop.f32.mrb[0].mxu1 }
 0x1d8   :  { %v210_v35 = vmul.f32 -1.442695, %v192_v34  ;;  %v269_v36 = vpop.f32.mrb[1].mxu1 }
 0x1da   :  { %304 = vpow2.f32 %v210_v35 }
 0x1e4   :  { %v305_v37 = vpop.eup %304 }
 0x1e5   :  { %v199_v38 = vadd.f32 1.0, %v305_v37 }
 0x1e7   :  { %306 = vrcp.f32 %v199_v38 }
 0x1f1   :  { %v307_v39 = vpop.eup %306 }
 0x1f2   :  { %202 = vst [vmem:[%s382_s3] sm:$0xff] %v307_v39 }
 0x1f3   :  { %207 = vsyncpa [#allocation3], 1 }

</bundles_post_ra>
